<compile_context>
chip_gen: v5e
topology: v5e:2x2
jax: 0.10.0
libtpu: 0.0.40
codegen_flags: <defaults>
</compile_context>

<pallas_src>
import jax
import jax.numpy as jnp
from jax.experimental import pallas as pl
from jax.experimental.pallas import tpu as pltpu


# ---------------------------------------------------------------------------
# Backward kernel: dx = (-alpha) * g   (elementwise, mem-bound)
# ---------------------------------------------------------------------------
def _neg_scale_kernel(neg_alpha_ref, g_ref, o_ref):
    g = g_ref[...]
    na = neg_alpha_ref[0]  # f32 scalar in SMEM (negation precomputed in wrapper)
    if jnp.issubdtype(g_ref.dtype, jnp.floating) and g_ref.dtype != jnp.float32:
        # Keep bf16/f16 math in the narrow dtype: halves vreg pressure and
        # avoids two per-vreg converts on the VALU (v6e/v7x).
        o_ref[...] = g * na.astype(g_ref.dtype)
    else:
        o_ref[...] = (g * na).astype(o_ref.dtype)


def _neg_scale_pallas(g, neg_alpha):
    """(-alpha) * g via a tiled, lane-dense Pallas kernel.

    Requires g.size % 128 == 0 (guaranteed by the `_neg_scale` dispatcher) so
    the 2D view needs no padding and the result needs no slicing.
    """
    shape, dtype = g.shape, g.dtype
    total = g.size
    itemsize = jnp.dtype(dtype).itemsize

    # Lane-dense column width: a multiple of 128 that divides total exactly.
    cols = next(c for c in (4096, 2048, 1024, 512, 256, 128) if total % c == 0)
    rows = total // cols
    g2d = g.reshape(rows, cols)  # free view for a contiguous cotangent

    # Packed-sublane multiple: 8 for f32, 16 for bf16/f16, 32 for int8/fp8.
    sub = 8 * max(1, 4 // itemsize)

    # ~4 MiB per input buffer (byte-capped, no row cap): amortizes the
    # ~0.35 us per-grid-step overhead; 4 double-buffered slabs = ~16 MiB,
    # well under the explicit 48 MiB VMEM limit (safe on v5e/v6e/v7x).
    tile_bytes = 4 * 1024 * 1024
    target_rows = max(sub, (tile_bytes // (cols * itemsize)) // sub * sub)

    # Full-extent block if everything fits in one tile; otherwise an aligned
    # tile with a (possibly ragged) final block handled by the cdiv grid —
    # no row padding of the array itself.
    tile_r = rows if rows <= target_rows else target_rows
    grid = (pl.cdiv(rows, tile_r),)

    out2d = pl.pallas_call(
        _neg_scale_kernel,
        out_shape=jax.ShapeDtypeStruct((rows, cols), dtype),
        grid=grid,
        in_specs=[
            pl.BlockSpec(memory_space=pltpu.MemorySpace.SMEM),   # -alpha scalar
            pl.BlockSpec((tile_r, cols), lambda i: (i, 0)),      # grad tile
        ],
        out_specs=pl.BlockSpec((tile_r, cols), lambda i: (i, 0)),
        # The cotangent is dead after this op: write dx in place of g.
        input_output_aliases={1: 0},
        compiler_params=pltpu.CompilerParams(
            dimension_semantics=("parallel",),
            vmem_limit_bytes=48 * 1024 * 1024,
        ),
        cost_estimate=pl.CostEstimate(
            flops=total,
            transcendentals=0,
            bytes_accessed=2 * total * itemsize + 4,
        ),
    )(neg_alpha, g2d)

    return out2d.reshape(shape)


_SMALL_ELEMS = 1 << 20  # below this, XLA fusion beats a kernel launch


def _neg_scale(g, alpha):
    """Dispatch: Pallas kernel for large lane-divisible cotangents, plain JAX
    otherwise (avoids pad/slice HBM round trips and launch overhead)."""
    total = g.size
    if total == 0 or total % 128 != 0 or total < _SMALL_ELEMS:
        scale = (-jnp.asarray(alpha, dtype=jnp.float32)).astype(g.dtype)
        return g * scale
    neg_alpha = (-jnp.asarray(alpha, dtype=jnp.float32)).reshape(1)
    return _neg_scale_pallas(g, neg_alpha)


# ---------------------------------------------------------------------------
# GradientReversal with custom VJP (matches the torch autograd Function)
# ---------------------------------------------------------------------------
@jax.custom_vjp
def gradient_reversal(x, alpha):
    # Forward is a pure identity: no kernel, no HBM traffic.
    return x


def _grad_rev_fwd(x, alpha):
    # Residual is alpha itself (keeps its own dtype so the zero cotangent we
    # return for it matches the primal aval).
    return x, jnp.asarray(alpha)


def _grad_rev_bwd(alpha, g):
    dx = _neg_scale(g, alpha)
    # alpha receives no gradient (the torch Function returns None for it).
    return dx, jnp.zeros_like(alpha)


gradient_reversal.defvjp(_grad_rev_fwd, _grad_rev_bwd)


# ---------------------------------------------------------------------------
# Main
# ---------------------------------------------------------------------------
if __name__ == "__main__":
    key = jax.random.PRNGKey(0)
    # NCHW input, small shapes (batch=2, channels=4, 16x16 spatial)
    x = jax.random.normal(key, (2, 4, 16, 16), dtype=jnp.float32)
    alpha = jnp.float32(0.5)

    # Forward pass: identity (no kernel).
    y = jax.block_until_ready(gradient_reversal(x, alpha))
    assert y.shape == x.shape and y.dtype == x.dtype
    assert jnp.allclose(y, x), "forward must be identity"

    # Run the backward Pallas kernel directly once and block on it
    # (2048 elements is 128-divisible, so the Pallas path is exercised here).
    g = jax.random.normal(jax.random.PRNGKey(1), x.shape, dtype=jnp.float32)
    neg_alpha = (-jnp.asarray(alpha, jnp.float32)).reshape(1)
    dx_pallas = jax.block_until_ready(_neg_scale_pallas(g, neg_alpha))
    assert jnp.allclose(dx_pallas, -alpha * g, rtol=1e-6, atol=1e-6), \
        "Pallas kernel must compute -alpha * g"

    # Full autodiff path (custom VJP; at this tiny size it takes the fused
    # plain-JAX fast path, large cotangents route to the Pallas kernel).
    loss_fn = lambda x_, a_: jnp.sum(gradient_reversal(x_, a_))
    dx = jax.block_until_ready(jax.grad(loss_fn, argnums=0)(x, alpha))
    assert jnp.allclose(dx, -alpha * jnp.ones_like(x)), "backward must be -alpha * g"

    print("KERNEL_OK")
</pallas_src>

<mosaic_0001>
module attributes {stable_mosaic.version = 11 : i64} {
  func.func @_neg_scale_kernel(%arg0: i32, %arg1: memref<1xf32, #tpu.memory_space<smem>>, %arg2: memref<1x2048xf32, #tpu.memory_space<vmem>>, %arg3: memref<1x2048xf32, #tpu.memory_space<vmem>>) attributes {dimension_semantics = [#tpu.dimension_semantics<parallel>], iteration_bounds = array<i64: 1>, scalar_prefetch = 0 : i64, scratch_operands = 0 : i64, tpu.core_type = #tpu.core_type<tc>, window_params = [{transform_indices = @transform_0, window_bounds = array<i64: 1>}, {transform_indices = @transform_1, window_bounds = array<i64: 1, 2048>}, {transform_indices = @transform_2, window_bounds = array<i64: 1, 2048>}]} {
    %c0 = arith.constant 0 : index
    %c0_0 = arith.constant 0 : index
    %0 = vector.load %arg2[%c0, %c0_0] : memref<1x2048xf32, #tpu.memory_space<vmem>>, vector<1x2048xf32>
    %c0_1 = arith.constant 0 : index
    %1 = memref.load %arg1[%c0_1] : memref<1xf32, #tpu.memory_space<smem>>
    %2 = vector.broadcast %1 : f32 to vector<1x2048xf32>
    %3 = arith.mulf %0, %2 : vector<1x2048xf32>
    %c0_2 = arith.constant 0 : index
    %c0_3 = arith.constant 0 : index
    %4 = vector.load %arg3[%c0_2, %c0_3] : memref<1x2048xf32, #tpu.memory_space<vmem>>, vector<1x2048xf32>
    tpu.vector_store %arg3[%c0_2, %c0_3], %3 {strides = array<i32>} : memref<1x2048xf32, #tpu.memory_space<vmem>>, vector<1x2048xf32>,
    return
  }
  func.func @transform_0(%arg0: i32) -> i32 {
    %c0_i32 = arith.constant 0 : i32
    %c0_i32_0 = arith.constant 0 : i32
    return %c0_i32 : i32
  }
  func.func @transform_1(%arg0: i32) -> (i32, i32) {
    %c0_i32 = arith.constant 0 : i32
    %c0_i32_0 = arith.constant 0 : i32
    return %arg0, %c0_i32 : i32, i32
  }
  func.func @transform_2(%arg0: i32) -> (i32, i32) {
    %c0_i32 = arith.constant 0 : i32
    %c0_i32_0 = arith.constant 0 : i32
    return %arg0, %c0_i32 : i32, i32
  }
}

</mosaic_0001>

<bundles_post_ra>
// kernel: tpu_custom_call.1
= control target key start
LH: loop header
LB: loop body
LE: loop exit
PB: predicated region body
PF: predicated region fallthrough
CT: control target
= control target key end

     0   :  { %8 = vsyncpa [#allocation4], 0  ;;  %s132_s0 = inlined_call_operand.<no memory space> [shape: f32[1], index: 0, kind: input, shape index: {}]   ;;  %s133_s1 = inlined_call_operand.hbm [shape: f32[1,2048], index: 1, kind: input, shape index: {}, may-alias: {1,2}]   ;;  %s134_s2 = inlined_call_operand.hbm [shape: f32[1,2048], index: 2, kind: output, shape index: {}, may-alias: {1,2}]  }
   0x1   :  { %9 = vsyncpa [#allocation5], 0  ;;  %s17_s11 = sshll.u32 %s133_s1, 4  ;;  %s106_s12 = smov [#allocation3]   ;;  %s18_s11 = int_to_ptr.hbm [resolvable:$true] %s17_s11 }
   0x2   :  { %s19_s13 = sshll.u32 %s106_s12, 4  ;;  %s20_s13 = int_to_ptr.vmem [resolvable:$true] %s19_s13 }
   0x3   :  { %22 = dma.hbm_to_vmem [thread:$0]  %s18_s11, 256, %s20_s13, [#allocation4]  }
   0x4   :  { %102 = dma.done.wait [#allocation4], 256  }
   0x5   :  { %103 = vsyncadd [#allocation4], 4294967040  ;;  %v30_v0 = vstv %s132_s0  ;;  %s107_s16 = smov [#allocation6]   ;;  %s42_s20 = sshll.u32 %s134_s2, 4  ;;  %v27_v1 = vld [vmem:[#allocation3] sm:$0xff]  ;;  %v28_v2 = vld [vmem:[#allocation3 + $0x8] sm:$0xff]  ;;  %s43_s20 = int_to_ptr.hbm [resolvable:$true] %s42_s20 }
   0x6   :  { %s40_s17 = sshll.u32 %s107_s16, 4  ;;  %v31_v3 = vmul.f32 %v30_v0, %v27_v1  ;;  %v32_v4 = vmul.f32 %v30_v0, %v28_v2  ;;  %s41_s17 = int_to_ptr.vmem [resolvable:$true] %s40_s17 }
   0x8   :  { %33 = vst [vmem:[#allocation6] sm:$0xff] %v31_v3 }
   0x9   :  { %34 = vst [vmem:[#allocation6 + $0x8] sm:$0xff] %v32_v4 }
   0xa   :  { %45 = dma.vmem_to_hbm [thread:$0]  %s41_s17, 256, %s43_s20, [#allocation5]  }
   0xb   :  { %104 = dma.done.wait [#allocation5], 256  }
   0xc   :  { %105 = vsyncadd [#allocation5], 4294967040 }
   0xd   :  { %50 = vsyncpa [#allocation4], 1 }
   0xe   :  { %51 = vsyncpa [#allocation5], 1 }

</bundles_post_ra>
